<compile_context>
chip_gen: v6e
topology: v6e:2x2x1
jax: 0.10.0
libtpu: 0.0.40
codegen_flags: <defaults>
</compile_context>

<pallas_src>
import functools

import jax
import jax.numpy as jnp
from jax import lax
from jax.experimental import pallas as pl
from jax.experimental.pallas import tpu as pltpu


def _mask_detectors_kernel(x_ref, cmask_ref, w1_ref, b1_ref, w2_ref, b2_ref,
                           mask_ref, emb_ref, *, B, C, F, H, W, k):
    # x_ref:     (B, F, L)     channel-major, flattened H-padded pixels + halo
    # cmask_ref: (k, H*W)      per-tap W-boundary validity (1.0 valid, 0.0 wrap)
    # w1_ref:    (C*F, k*k*F)  stacked per-class im2col conv weights
    # b1_ref:    (C*F, 1)
    # w2_ref:    (C*F, 1)      per-class 1x1 conv weights, row = c*F + f
    # b2_ref:    (C, 1)
    # mask_ref:  (B, C, H*W)
    # emb_ref:   (B, C*F, H*W)
    HW = H * W
    pad = k // 2

    cmask = cmask_ref[...]                           # (k, HW)
    w1 = w1_ref[...]                                 # (CF, KKF)
    b1 = b1_ref[...]                                 # (CF, 1)
    w2 = w2_ref[...]                                 # (CF, 1)
    b2 = b2_ref[...]                                 # (C, 1)

    # im2col with pixels on the lane axis. Tap (kh, kw) of batch b is the
    # contiguous slice x[b, :, kh*W+kw : kh*W+kw + HW]; only the W-direction
    # wrap-around of the flat layout needs a mask multiply. Taps stack along
    # sublanes (F=8 -> tile aligned), no lane-axis concat.
    def patches_for(xb):                             # xb: (F, L)
        taps = []
        for kh in range(k):
            for kw in range(k):
                s = kh * W + kw
                t = xb[:, s:s + HW]                  # (F, HW) lane-dense slice
                if kw != pad:                        # center column: all valid
                    t = t * cmask[kw:kw + 1, :]
                taps.append(t)
        return jnp.concatenate(taps, axis=0)         # (k*k*F, HW)

    patches = jnp.concatenate(
        [patches_for(x_ref[b]) for b in range(B)], axis=1)   # (KKF, B*HW)

    # Fused kxk conv for all classes and all batch elements in one NN
    # contraction: (CF, KKF) x (KKF, B*HW) -> (CF, B*HW), channel-major with
    # pixels dense on lanes.
    acts = jnp.dot(w1, patches, preferred_element_type=jnp.float32)
    emb = jnp.maximum(acts + b1, 0.0)                # bias + ReLU

    # Per-class 1x1 conv + sigmoid as VPU multiply + length-F sublane
    # reduction (no block-diagonal matmul, no O(C^2*F) weight).
    weighted = emb * w2                              # (CF, B*HW)
    logit = jnp.sum(weighted.reshape(C, F, B * HW), axis=1) + b2
    masks = jax.nn.sigmoid(logit)                    # (C, B*HW)

    for b in range(B):                               # lane-aligned output slabs
        emb_ref[b] = emb[:, b * HW:(b + 1) * HW].astype(emb_ref.dtype)
        mask_ref[b] = masks[:, b * HW:(b + 1) * HW].astype(mask_ref.dtype)


@jax.jit
def mask_detectors_forward(x_nchw, w1, b1, w2, b2):
    """Pallas implementation of MaskDetectors.forward.

    Args:
      x_nchw: (B, F, H, W) float32 embeddings (PyTorch NCHW).
      w1: (classes, F, F, k, k)  per-class kxk conv weights (torch OIHW).
      b1: (classes, F)
      w2: (classes, 1, F, 1, 1)  per-class 1x1 conv weights (torch OIHW).
      b2: (classes, 1)
    Returns:
      masks:            (B, classes, H, W)
      masks_embeddings: (B, classes, F, H, W)
    """
    B, F, H, W = x_nchw.shape
    C = w1.shape[0]
    k = w1.shape[-1]
    pad = k // 2            # matches PyTorch padding=k//2 (odd filter_size)
    # TODO(synk): even filter_size would need asymmetric padding; not handled.
    HW, CF, KKF = H * W, C * F, k * k * F
    L = HW + 2 * pad * W + 2 * pad      # flattened H-padded pixels + flat halo

    # ---- input glue: channel-major, flattened pixel axis last (lane-dense) ----
    x_f32 = x_nchw.astype(jnp.float32)
    x_hpad = jnp.pad(x_f32, ((0, 0), (0, 0), (pad, pad), (0, 0)))    # pad H only
    x_ext = jnp.pad(x_hpad.reshape(B, F, (H + 2 * pad) * W),
                    ((0, 0), (0, 0), (pad, pad)))                    # (B, F, L)

    # Per-tap W-boundary masks: tap column offset dw = kw - pad is valid for an
    # output pixel in column w iff 0 <= w + dw < W (kills flat wrap-around).
    w_of_pix = jnp.broadcast_to(jnp.arange(W, dtype=jnp.int32)[None, :],
                                (H, W)).reshape(HW)
    shifted = w_of_pix[None, :] + (jnp.arange(k, dtype=jnp.int32) - pad)[:, None]
    col_mask = ((shifted >= 0) & (shifted < W)).astype(jnp.float32)  # (k, HW)

    # ---- weight glue ----
    # torch OIHW (C, Fo, Fi, k, k) -> im2col matrix: row = c*F + fo,
    # col = (kh*k + kw)*F + fi  (must match the in-kernel tap order).
    w1_mat = jnp.transpose(w1, (0, 1, 3, 4, 2)).reshape(CF, KKF).astype(jnp.float32)
    b1_col = b1.reshape(CF, 1).astype(jnp.float32)
    w2_col = w2.reshape(CF, 1).astype(jnp.float32)   # row = c*F + f
    b2_col = b2.reshape(C, 1).astype(jnp.float32)

    kernel = functools.partial(_mask_detectors_kernel,
                               B=B, C=C, F=F, H=H, W=W, k=k)

    cost = pl.CostEstimate(
        flops=2 * B * HW * CF * (KKF + 1),
        transcendentals=B * C * HW,                  # sigmoid
        bytes_accessed=4 * (B * F * L + k * HW + CF * KKF + CF + CF + C
                            + B * C * HW + B * CF * HW))

    # Single invocation (no grid): at these sizes everything fits VMEM easily,
    # so there is no grid-step overhead and no double-buffering of the
    # constant weights.
    masks_flat, emb_flat = pl.pallas_call(
        kernel,
        out_shape=(
            jax.ShapeDtypeStruct((B, C, HW), jnp.float32),
            jax.ShapeDtypeStruct((B, CF, HW), jnp.float32),
        ),
        cost_estimate=cost,
        compiler_params=pltpu.CompilerParams(vmem_limit_bytes=32 * 1024 * 1024),
    )(x_ext, col_mask, w1_mat, b1_col, w2_col, b2_col)

    # Kernel already emits the final memory order -> only free reshapes here.
    masks = masks_flat.reshape(B, C, H, W)
    masks_embeddings = emb_flat.reshape(B, C, F, H, W)
    return masks, masks_embeddings


def reference_forward(x, w1, b1, w2, b2):
    """Pure-JAX NCHW reference matching the PyTorch semantics."""
    classes = w1.shape[0]
    masks, embs = [], []
    dn = ("NCHW", "OIHW", "NCHW")
    for c in range(classes):
        y = lax.conv_general_dilated(x, w1[c], (1, 1), "SAME",
                                     dimension_numbers=dn)
        y = y + b1[c][None, :, None, None]
        emb = jnp.maximum(y, 0.0)
        m = lax.conv_general_dilated(emb, w2[c], (1, 1), "SAME",
                                     dimension_numbers=dn)
        m = m + b2[c][None, :, None, None]
        masks.append(jax.nn.sigmoid(m))
        embs.append(emb[:, None])
    return jnp.concatenate(masks, 1), jnp.concatenate(embs, 1)


if __name__ == "__main__":
    B, classes, F, H, W, k = 2, 3, 8, 16, 16, 3   # F = filter_banks, k = filter_size

    key = jax.random.PRNGKey(0)
    k1, k2, k3, k4, k5 = jax.random.split(key, 5)

    # Deterministic PyTorch-style uniform init (bound = 1/sqrt(fan_in)).
    bound1 = 1.0 / (F * k * k) ** 0.5
    w1 = jax.random.uniform(k1, (classes, F, F, k, k), jnp.float32,
                            -bound1, bound1)
    b1 = jax.random.uniform(k2, (classes, F), jnp.float32, -bound1, bound1)
    bound2 = 1.0 / F ** 0.5
    w2 = jax.random.uniform(k3, (classes, 1, F, 1, 1), jnp.float32,
                            -bound2, bound2)
    b2 = jax.random.uniform(k4, (classes, 1), jnp.float32, -bound2, bound2)

    x = jax.random.normal(k5, (B, F, H, W), jnp.float32)

    masks, masks_embeddings = jax.block_until_ready(
        mask_detectors_forward(x, w1, b1, w2, b2))

    assert masks.shape == (B, classes, H, W)
    assert masks_embeddings.shape == (B, classes, F, H, W)

    ref_masks, ref_embs = reference_forward(x, w1, b1, w2, b2)
    # TPU default matmul precision runs f32 operands through bf16 passes;
    # 1e-3 comfortably covers that while still catching any layout/offset bug.
    assert jnp.allclose(masks, ref_masks, rtol=1e-3, atol=1e-3)
    assert jnp.allclose(masks_embeddings, ref_embs, rtol=1e-3, atol=1e-3)

    print("KERNEL_OK")
</pallas_src>

<mosaic_0001>
module attributes {stable_mosaic.version = 11 : i64} {
  func.func @_mask_detectors_kernel(%arg0: memref<2x8x290xf32, #tpu.memory_space<vmem>>, %arg1: memref<3x256xf32, #tpu.memory_space<vmem>>, %arg2: memref<24x72xf32, #tpu.memory_space<vmem>>, %arg3: memref<24x1xf32, #tpu.memory_space<vmem>>, %arg4: memref<24x1xf32, #tpu.memory_space<vmem>>, %arg5: memref<3x1xf32, #tpu.memory_space<vmem>>, %arg6: memref<2x3x256xf32, #tpu.memory_space<vmem>>, %arg7: memref<2x24x256xf32, #tpu.memory_space<vmem>>) attributes {dimension_semantics = [], scalar_prefetch = 0 : i64, scratch_operands = 0 : i64, tpu.core_type = #tpu.core_type<tc>} {
    %c0 = arith.constant 0 : index
    %c0_0 = arith.constant 0 : index
    %0 = vector.load %arg1[%c0, %c0_0] : memref<3x256xf32, #tpu.memory_space<vmem>>, vector<3x256xf32>
    %c0_1 = arith.constant 0 : index
    %c0_2 = arith.constant 0 : index
    %1 = vector.load %arg2[%c0_1, %c0_2] : memref<24x72xf32, #tpu.memory_space<vmem>>, vector<24x72xf32>
    %c0_3 = arith.constant 0 : index
    %c0_4 = arith.constant 0 : index
    %2 = vector.load %arg3[%c0_3, %c0_4] : memref<24x1xf32, #tpu.memory_space<vmem>>, vector<24x1xf32>
    %c0_5 = arith.constant 0 : index
    %c0_6 = arith.constant 0 : index
    %3 = vector.load %arg4[%c0_5, %c0_6] : memref<24x1xf32, #tpu.memory_space<vmem>>, vector<24x1xf32>
    %c0_7 = arith.constant 0 : index
    %c0_8 = arith.constant 0 : index
    %4 = vector.load %arg5[%c0_7, %c0_8] : memref<3x1xf32, #tpu.memory_space<vmem>>, vector<3x1xf32>
    %c0_9 = arith.constant 0 : index
    %c0_10 = arith.constant 0 : index
    %c0_11 = arith.constant 0 : index
    %5 = vector.load %arg0[%c0_9, %c0_10, %c0_11] : memref<2x8x290xf32, #tpu.memory_space<vmem>>, vector<1x8x290xf32>
    %6 = vector.shape_cast %5 : vector<1x8x290xf32> to vector<8x290xf32>
    %7 = vector.extract_strided_slice %6 {offsets = [0, 0], sizes = [8, 256], strides = [1, 1]} : vector<8x290xf32> to vector<8x256xf32>
    %8 = vector.extract_strided_slice %0 {offsets = [0, 0], sizes = [1, 256], strides = [1, 1]} : vector<3x256xf32> to vector<1x256xf32>
    %9 = vector.broadcast %8 : vector<1x256xf32> to vector<8x256xf32>
    %10 = arith.mulf %7, %9 : vector<8x256xf32>
    %11 = vector.extract_strided_slice %6 {offsets = [0, 1], sizes = [8, 256], strides = [1, 1]} : vector<8x290xf32> to vector<8x256xf32>
    %12 = vector.extract_strided_slice %6 {offsets = [0, 2], sizes = [8, 256], strides = [1, 1]} : vector<8x290xf32> to vector<8x256xf32>
    %13 = vector.extract_strided_slice %0 {offsets = [2, 0], sizes = [1, 256], strides = [1, 1]} : vector<3x256xf32> to vector<1x256xf32>
    %14 = vector.broadcast %13 : vector<1x256xf32> to vector<8x256xf32>
    %15 = arith.mulf %12, %14 : vector<8x256xf32>
    %16 = vector.extract_strided_slice %6 {offsets = [0, 16], sizes = [8, 256], strides = [1, 1]} : vector<8x290xf32> to vector<8x256xf32>
    %17 = vector.extract_strided_slice %0 {offsets = [0, 0], sizes = [1, 256], strides = [1, 1]} : vector<3x256xf32> to vector<1x256xf32>
    %18 = vector.broadcast %17 : vector<1x256xf32> to vector<8x256xf32>
    %19 = arith.mulf %16, %18 : vector<8x256xf32>
    %20 = vector.extract_strided_slice %6 {offsets = [0, 17], sizes = [8, 256], strides = [1, 1]} : vector<8x290xf32> to vector<8x256xf32>
    %21 = vector.extract_strided_slice %6 {offsets = [0, 18], sizes = [8, 256], strides = [1, 1]} : vector<8x290xf32> to vector<8x256xf32>
    %22 = vector.extract_strided_slice %0 {offsets = [2, 0], sizes = [1, 256], strides = [1, 1]} : vector<3x256xf32> to vector<1x256xf32>
    %23 = vector.broadcast %22 : vector<1x256xf32> to vector<8x256xf32>
    %24 = arith.mulf %21, %23 : vector<8x256xf32>
    %25 = vector.extract_strided_slice %6 {offsets = [0, 32], sizes = [8, 256], strides = [1, 1]} : vector<8x290xf32> to vector<8x256xf32>
    %26 = vector.extract_strided_slice %0 {offsets = [0, 0], sizes = [1, 256], strides = [1, 1]} : vector<3x256xf32> to vector<1x256xf32>
    %27 = vector.broadcast %26 : vector<1x256xf32> to vector<8x256xf32>
    %28 = arith.mulf %25, %27 : vector<8x256xf32>
    %29 = vector.extract_strided_slice %6 {offsets = [0, 33], sizes = [8, 256], strides = [1, 1]} : vector<8x290xf32> to vector<8x256xf32>
    %30 = vector.extract_strided_slice %6 {offsets = [0, 34], sizes = [8, 256], strides = [1, 1]} : vector<8x290xf32> to vector<8x256xf32>
    %31 = vector.extract_strided_slice %0 {offsets = [2, 0], sizes = [1, 256], strides = [1, 1]} : vector<3x256xf32> to vector<1x256xf32>
    %32 = vector.broadcast %31 : vector<1x256xf32> to vector<8x256xf32>
    %33 = arith.mulf %30, %32 : vector<8x256xf32>
    %34 = tpu.concatenate %10, %11, %15, %19, %20, %24, %28, %29, %33 in 0 : vector<8x256xf32>, vector<8x256xf32>, vector<8x256xf32>, vector<8x256xf32>, vector<8x256xf32>, vector<8x256xf32>, vector<8x256xf32>, vector<8x256xf32>, vector<8x256xf32> -> vector<72x256xf32>
    %c1 = arith.constant 1 : index
    %c0_12 = arith.constant 0 : index
    %c0_13 = arith.constant 0 : index
    %35 = vector.load %arg0[%c1, %c0_12, %c0_13] : memref<2x8x290xf32, #tpu.memory_space<vmem>>, vector<1x8x290xf32>
    %36 = vector.shape_cast %35 : vector<1x8x290xf32> to vector<8x290xf32>
    %37 = vector.extract_strided_slice %36 {offsets = [0, 0], sizes = [8, 256], strides = [1, 1]} : vector<8x290xf32> to vector<8x256xf32>
    %38 = vector.extract_strided_slice %0 {offsets = [0, 0], sizes = [1, 256], strides = [1, 1]} : vector<3x256xf32> to vector<1x256xf32>
    %39 = vector.broadcast %38 : vector<1x256xf32> to vector<8x256xf32>
    %40 = arith.mulf %37, %39 : vector<8x256xf32>
    %41 = vector.extract_strided_slice %36 {offsets = [0, 1], sizes = [8, 256], strides = [1, 1]} : vector<8x290xf32> to vector<8x256xf32>
    %42 = vector.extract_strided_slice %36 {offsets = [0, 2], sizes = [8, 256], strides = [1, 1]} : vector<8x290xf32> to vector<8x256xf32>
    %43 = vector.extract_strided_slice %0 {offsets = [2, 0], sizes = [1, 256], strides = [1, 1]} : vector<3x256xf32> to vector<1x256xf32>
    %44 = vector.broadcast %43 : vector<1x256xf32> to vector<8x256xf32>
    %45 = arith.mulf %42, %44 : vector<8x256xf32>
    %46 = vector.extract_strided_slice %36 {offsets = [0, 16], sizes = [8, 256], strides = [1, 1]} : vector<8x290xf32> to vector<8x256xf32>
    %47 = vector.extract_strided_slice %0 {offsets = [0, 0], sizes = [1, 256], strides = [1, 1]} : vector<3x256xf32> to vector<1x256xf32>
    %48 = vector.broadcast %47 : vector<1x256xf32> to vector<8x256xf32>
    %49 = arith.mulf %46, %48 : vector<8x256xf32>
    %50 = vector.extract_strided_slice %36 {offsets = [0, 17], sizes = [8, 256], strides = [1, 1]} : vector<8x290xf32> to vector<8x256xf32>
    %51 = vector.extract_strided_slice %36 {offsets = [0, 18], sizes = [8, 256], strides = [1, 1]} : vector<8x290xf32> to vector<8x256xf32>
    %52 = vector.extract_strided_slice %0 {offsets = [2, 0], sizes = [1, 256], strides = [1, 1]} : vector<3x256xf32> to vector<1x256xf32>
    %53 = vector.broadcast %52 : vector<1x256xf32> to vector<8x256xf32>
    %54 = arith.mulf %51, %53 : vector<8x256xf32>
    %55 = vector.extract_strided_slice %36 {offsets = [0, 32], sizes = [8, 256], strides = [1, 1]} : vector<8x290xf32> to vector<8x256xf32>
    %56 = vector.extract_strided_slice %0 {offsets = [0, 0], sizes = [1, 256], strides = [1, 1]} : vector<3x256xf32> to vector<1x256xf32>
    %57 = vector.broadcast %56 : vector<1x256xf32> to vector<8x256xf32>
    %58 = arith.mulf %55, %57 : vector<8x256xf32>
    %59 = vector.extract_strided_slice %36 {offsets = [0, 33], sizes = [8, 256], strides = [1, 1]} : vector<8x290xf32> to vector<8x256xf32>
    %60 = vector.extract_strided_slice %36 {offsets = [0, 34], sizes = [8, 256], strides = [1, 1]} : vector<8x290xf32> to vector<8x256xf32>
    %61 = vector.extract_strided_slice %0 {offsets = [2, 0], sizes = [1, 256], strides = [1, 1]} : vector<3x256xf32> to vector<1x256xf32>
    %62 = vector.broadcast %61 : vector<1x256xf32> to vector<8x256xf32>
    %63 = arith.mulf %60, %62 : vector<8x256xf32>
    %64 = tpu.concatenate %40, %41, %45, %49, %50, %54, %58, %59, %63 in 0 : vector<8x256xf32>, vector<8x256xf32>, vector<8x256xf32>, vector<8x256xf32>, vector<8x256xf32>, vector<8x256xf32>, vector<8x256xf32>, vector<8x256xf32>, vector<8x256xf32> -> vector<72x256xf32>
    %65 = tpu.concatenate %34, %64 in 1 : vector<72x256xf32>, vector<72x256xf32> -> vector<72x512xf32>
    %cst = arith.constant dense<0.000000e+00> : vector<24x512xf32>
    %66 = tpu.matmul %1, %65, %cst {dimension_numbers = #tpu.dot_dimension_numbers<[1], [0], [0], [1], [0, 0, 1, 1], [], []>} : vector<24x72xf32>, vector<72x512xf32>, vector<24x512xf32> -> vector<24x512xf32>
    %67 = vector.broadcast %2 : vector<24x1xf32> to vector<24x512xf32>
    %68 = arith.addf %66, %67 : vector<24x512xf32>
    %cst_14 = arith.constant 0.000000e+00 : f32
    %69 = vector.broadcast %cst_14 : f32 to vector<24x512xf32>
    %70 = arith.maximumf %68, %69 : vector<24x512xf32>
    %71 = vector.broadcast %3 : vector<24x1xf32> to vector<24x512xf32>
    %72 = arith.mulf %70, %71 : vector<24x512xf32>
    %73 = vector.shape_cast %72 : vector<24x512xf32> to vector<3x8x512xf32>
    %cst_15 = arith.constant dense<0.000000e+00> : vector<3x512xf32>
    %74 = vector.multi_reduction <add>, %73, %cst_15 [1] : vector<3x8x512xf32> to vector<3x512xf32>
    %75 = vector.broadcast %4 : vector<3x1xf32> to vector<3x512xf32>
    %76 = arith.addf %74, %75 : vector<3x512xf32>
    %77 = arith.negf %76 : vector<3x512xf32>
    %78 = math.exp %77 : vector<3x512xf32>
    %cst_16 = arith.constant 1.000000e+00 : f32
    %79 = vector.broadcast %cst_16 : f32 to vector<3x512xf32>
    %80 = arith.addf %79, %78 : vector<3x512xf32>
    %81 = arith.divf %79, %80 : vector<3x512xf32>
    %82 = vector.extract_strided_slice %70 {offsets = [0, 0], sizes = [24, 256], strides = [1, 1]} : vector<24x512xf32> to vector<24x256xf32>
    %c0_17 = arith.constant 0 : index
    %c0_18 = arith.constant 0 : index
    %c0_19 = arith.constant 0 : index
    %83 = vector.load %arg7[%c0_17, %c0_18, %c0_19] : memref<2x24x256xf32, #tpu.memory_space<vmem>>, vector<1x24x256xf32>
    %84 = vector.shape_cast %83 : vector<1x24x256xf32> to vector<24x256xf32>
    %85 = vector.shape_cast %82 : vector<24x256xf32> to vector<1x24x256xf32>
    tpu.vector_store %arg7[%c0_17, %c0_18, %c0_19], %85 {strides = array<i32>} : memref<2x24x256xf32, #tpu.memory_space<vmem>>, vector<1x24x256xf32>,
    %86 = vector.extract_strided_slice %81 {offsets = [0, 0], sizes = [3, 256], strides = [1, 1]} : vector<3x512xf32> to vector<3x256xf32>
    %c0_20 = arith.constant 0 : index
    %c0_21 = arith.constant 0 : index
    %c0_22 = arith.constant 0 : index
    %87 = vector.load %arg6[%c0_20, %c0_21, %c0_22] : memref<2x3x256xf32, #tpu.memory_space<vmem>>, vector<1x3x256xf32>
    %88 = vector.shape_cast %87 : vector<1x3x256xf32> to vector<3x256xf32>
    %89 = vector.shape_cast %86 : vector<3x256xf32> to vector<1x3x256xf32>
    tpu.vector_store %arg6[%c0_20, %c0_21, %c0_22], %89 {strides = array<i32>} : memref<2x3x256xf32, #tpu.memory_space<vmem>>, vector<1x3x256xf32>,
    %90 = vector.extract_strided_slice %70 {offsets = [0, 256], sizes = [24, 256], strides = [1, 1]} : vector<24x512xf32> to vector<24x256xf32>
    %c1_23 = arith.constant 1 : index
    %c0_24 = arith.constant 0 : index
    %c0_25 = arith.constant 0 : index
    %91 = vector.load %arg7[%c1_23, %c0_24, %c0_25] : memref<2x24x256xf32, #tpu.memory_space<vmem>>, vector<1x24x256xf32>
    %92 = vector.shape_cast %91 : vector<1x24x256xf32> to vector<24x256xf32>
    %93 = vector.shape_cast %90 : vector<24x256xf32> to vector<1x24x256xf32>
    tpu.vector_store %arg7[%c1_23, %c0_24, %c0_25], %93 {strides = array<i32>} : memref<2x24x256xf32, #tpu.memory_space<vmem>>, vector<1x24x256xf32>,
    %94 = vector.extract_strided_slice %81 {offsets = [0, 256], sizes = [3, 256], strides = [1, 1]} : vector<3x512xf32> to vector<3x256xf32>
    %c1_26 = arith.constant 1 : index
    %c0_27 = arith.constant 0 : index
    %c0_28 = arith.constant 0 : index
    %95 = vector.load %arg6[%c1_26, %c0_27, %c0_28] : memref<2x3x256xf32, #tpu.memory_space<vmem>>, vector<1x3x256xf32>
    %96 = vector.shape_cast %95 : vector<1x3x256xf32> to vector<3x256xf32>
    %97 = vector.shape_cast %94 : vector<3x256xf32> to vector<1x3x256xf32>
    tpu.vector_store %arg6[%c1_26, %c0_27, %c0_28], %97 {strides = array<i32>} : memref<2x3x256xf32, #tpu.memory_space<vmem>>, vector<1x3x256xf32>,
    return
  }
}

</mosaic_0001>

<bundles_post_ra>
// kernel: mask_detectors_forward.1
= control target key start
LH: loop header
LB: loop body
LE: loop exit
PB: predicated region body
PF: predicated region fallthrough
CT: control target
= control target key end

     0   :  { %v40_v0 = vlaneseq  ;;  %s915_s26 = smov 34   ;;  %s916_s27 = smov 32   ;;  %vm134_vm0 = vcmask 277504   ;;  %vm122_vm1 = vcmask 261120   ;;  %vm110_vm2 = vcmask 146432   ;;  %s1268_s1 = inlined_call_operand.vmem [shape: f32[3,256], index: 1, kind: input, shape index: {}]   ;;  %s1269_s0 = inlined_call_operand.vmem [shape: f32[2,8,290], index: 0, kind: input, shape index: {}]   ;;  %s1270_s3 = inlined_call_operand.vmem [shape: f32[24,1], index: 3, kind: input, shape index: {}]   ;;  %s1271_s4 = inlined_call_operand.vmem [shape: f32[24,1], index: 4, kind: input, shape index: {}]   ;;  %s1272_s5 = inlined_call_operand.vmem [shape: f32[3,1], index: 5, kind: input, shape index: {}]   ;;  %s1273_s2 = inlined_call_operand.vmem [shape: f32[24,72], index: 2, kind: input, shape index: {}]   ;;  %s1274_s7 = inlined_call_operand.vmem [shape: f32[2,24,256], index: 7, kind: output, shape index: {1}]   ;;  %s1275_s6 = inlined_call_operand.vmem [shape: f32[2,3,256], index: 6, kind: output, shape index: {0}]  }
   0x1   :  { %v25_v2 = vld [vmem:[%s1268_s1] sm:$0x77]  ;;  %s917_s1 = smov 18   ;;  %s918_s28 = smov 16   ;;  %v984_v15 = vld [vmem:[%s1269_s0 + $0x8] sm:$0xff]  ;;  %v989_v16 = vld [vmem:[%s1269_s0 + $0x10] sm:$0xff] }
   0x2   :  { %v41_v1 = vshrl.u32 %v40_v0, 7  ;;  %s919_s29 = smov 2   ;;  %s920_s11 = smov 95   ;;  %v996_v17 = vld [vmem:[%s1269_s0 + $0x20] sm:$0xff]  ;;  %v1001_v18 = vld [vmem:[%s1269_s0 + $0x28] sm:$0xff]  ;;  %v1013_v20 = vld [vmem:[%s1269_s0 + $0x18] sm:$0xff] }
   0x3   :  { %v1008_v19 = vld [vmem:[%s1269_s0] sm:$0xff]  ;;  %s921_s20 = smov 111   ;;  %s922_s21 = smov 127   ;;  %vm98_vm3 = vcmask 130048   ;;  %vm84_vm4 = vcmask 15360   ;;  %v928_v63 = vmov 0.0  }
   0x4   :  { %v62_v3 = vsub.s32 2, %v41_v1  ;;  %v66_v4 = vsub.s32 6, %v41_v1  ;;  %v42_v5 = vsub.s32 0, %v41_v1  ;;  %v46_v6 = vsub.s32 4, %v41_v1  ;;  %s923_s0 = smov 94   ;;  %s924_s22 = smov 96   ;;  %456 = vmatprep.mubr.f32.mxu0 %v928_v63  ;;  %539 = vmatprep.mubr.f32.mxu1 %v928_v63 }
   0x5   :  { %s925_s23 = smov 110   ;;  %s926_s24 = smov 112   ;;  %vm243_vm5 = vcmask 769024   ;;  %vm229_vm6 = vcmask 777216   ;;  %vm218_vm7 = vcmask 785408   ;;  %vm204_vm8 = vcmask 900096  }
   0x6   :  { %v63_v7 = vrot.slane %v25_v2, %v62_v3  ;;  %v67_v8 = vrot.slane %v25_v2, %v66_v4  ;;  %v43_v9 = vrot.slane %v25_v2, %v42_v5  ;;  %v47_v10 = vrot.slane %v25_v2, %v46_v6  ;;  %s927_s25 = smov 126   ;;  %v30_v4 = vld [vmem:[%s1270_s3 + $0x8] sm:$0xff] }
   0x7   :  { %v33_v6 = vld [vmem:[%s1271_s4 + $0x8] sm:$0xff]  ;;  %vm190_vm9 = vcmask 908288   ;;  %vm179_vm10 = vcmask 916480   ;;  %vm165_vm11 = vcmask 1031168   ;;  %vm151_vm12 = vcmask 1039360  }
   0x8   :  { %v73_v11 = vrot.slane %v63_v7, %v62_v3  ;;  %v973_v12 = vrot.slane %v43_v9, %v42_v5  ;;  %v77_v13 = vrot.slane %v67_v8, %v62_v3  ;;  %v976_v14 = vrot.slane %v47_v10, %v42_v5  ;;  %v29_v5 = vld [vmem:[%s1270_s3] sm:$0xff]  ;;  %v31_v8 = vld [vmem:[%s1270_s3 + $0x10] sm:$0xff] }
   0x9   :  { %v929_v3 = vmov 0   ;;  %v34_v9 = vld [vmem:[%s1271_s4 + $0x10] sm:$0xff]  ;;  %vm382_vm13 = vcmask 588800   ;;  %vm778_vm14 = vcmask 1041409   ;;  %vm780_vm15 = vcmask 1045509  }
   0xa   :  { %130 = vrot.lane.b32.xlu0 %v73_v11, %s915_s26  ;;  %118 = vrot.lane.b32.xlu1 %v973_v12, %s916_s27 }
   0xb   :  { %865 = vset.pattern.permute.xlu0 %v929_v3  ;;  %866 = vset.pattern.permute.xlu1 %v929_v3 }
   0xe   :  { %132 = vrot.lane.b32.xlu0 %v77_v13, %s915_s26  ;;  %120 = vrot.lane.b32.xlu1 %v976_v14, %s916_s27 }
  0x12   :  { %106 = vrot.lane.b32.xlu0 %v73_v11, %s917_s1  ;;  %108 = vrot.lane.b32.xlu1 %v77_v13, %s917_s1 }
  0x16   :  { %94 = vrot.lane.b32.xlu0 %v973_v12, %s918_s28  ;;  %96 = vrot.lane.b32.xlu1 %v976_v14, %s918_s28 }
  0x1a   :  { %80 = vrot.lane.b32.xlu0 %v73_v11, %s919_s29  ;;  %82 = vrot.lane.b32.xlu1 %v77_v13, %s919_s29  ;;  %v32_v11 = vld [vmem:[%s1271_s4] sm:$0xff] }
  0x1e   :  { %225 = vrot.lane.b32.xlu0 %v984_v15, %s920_s11  ;;  %227 = vrot.lane.b32.xlu1 %v989_v16, %s920_s11 }
  0x22   :  { %346 = vrot.lane.b32.xlu0 %v996_v17, %s920_s11  ;;  %348 = vrot.lane.b32.xlu1 %v1001_v18, %s920_s11 }
  0x26   :  { %223 = vrot.lane.b32.xlu0 %v1008_v19, %s920_s11  ;;  %344 = vrot.lane.b32.xlu1 %v1013_v20, %s920_s11 }
  0x2a   :  { %186 = vrot.lane.b32.xlu0 %v984_v15, %s921_s20  ;;  %188 = vrot.lane.b32.xlu1 %v989_v16, %s921_s20 }
  0x2e   :  { %310 = vrot.lane.b32.xlu0 %v996_v17, %s921_s20  ;;  %312 = vrot.lane.b32.xlu1 %v1001_v18, %s921_s20 }
  0x32   :  { %184 = vrot.lane.b32.xlu0 %v1008_v19, %s921_s20  ;;  %308 = vrot.lane.b32.xlu1 %v1013_v20, %s921_s20 }
  0x36   :  { %147 = vrot.lane.b32.xlu0 %v984_v15, %s922_s21  ;;  %149 = vrot.lane.b32.xlu1 %v989_v16, %s922_s21 }
  0x3a   :  { %274 = vrot.lane.b32.xlu0 %v996_v17, %s922_s21  ;;  %276 = vrot.lane.b32.xlu1 %v1001_v18, %s922_s21 }
  0x7c   :  { %v131_v21 = vpop.permute.xlu0 %130  ;;  %v119_v22 = vpop.permute.xlu1 %118 }
  0x7d   :  { %v139_v23 = vmul.f32 %v131_v21, %v1008_v19  ;;  %v127_v24 = vmul.f32 %v119_v22, %v1008_v19  ;;  %v266_v31 = vmul.f32 %v1013_v20, %v131_v21  ;;  %v263_v40 = vmul.f32 %v1013_v20, %v119_v22 }
  0x7f   :  { %237 = vrot.lane.b32.xlu0 %v139_v23, %s923_s0 }
  0x80   :  { %v133_v25 = vpop.permute.xlu0 %132  ;;  %v121_v33 = vpop.permute.xlu1 %120 }
  0x81   :  { %v141_v26 = vmul.f32 %v133_v25, %v989_v16  ;;  %v268_v28 = vmul.f32 %v1001_v18, %v133_v25  ;;  %v129_v34 = vmul.f32 %v121_v33, %v989_v16  ;;  %v135_v37 = vsel %vm134_vm0, %v131_v21, %v133_v25 }
  0x82   :  { %v265_v38 = vmul.f32 %v1001_v18, %v121_v33  ;;  %v140_v39 = vmul.f32 %v135_v37, %v984_v15  ;;  %v267_v41 = vmul.f32 %v996_v17, %v135_v37  ;;  %v123_v42 = vsel %vm122_vm1, %v119_v22, %v121_v33 }
  0x83   :  { %241 = vrot.lane.b32.xlu1 %v141_v26, %s923_s0  ;;  %212 = vrot.lane.b32.xlu0 %v127_v24, %s924_s22  ;;  %v128_v45 = vmul.f32 %v123_v42, %v984_v15  ;;  %v264_v47 = vmul.f32 %v996_v17, %v123_v42  ;;  %vm783_vm0 = vcmask 1042434   ;;  %vm785_vm1 = vcmask 1046534  }
  0x84   :  { %v107_v27 = vpop.permute.xlu0 %106  ;;  %v109_v43 = vpop.permute.xlu1 %108 }
  0x85   :  { %v115_v29 = vmul.f32 %v107_v27, %v1008_v19  ;;  %v117_v44 = vmul.f32 %v109_v43, %v989_v16  ;;  %v262_v46 = vmul.f32 %v1001_v18, %v109_v43  ;;  %v111_v48 = vsel %vm110_vm2, %v107_v27, %v109_v43 }
  0x86   :  { %v260_v49 = vmul.f32 %v1013_v20, %v107_v27  ;;  %v116_v50 = vmul.f32 %v111_v48, %v984_v15  ;;  %v261_v53 = vmul.f32 %v996_v17, %v111_v48 }
  0x87   :  { %361 = vrot.lane.b32.xlu1 %v268_v28, %s923_s0  ;;  %198 = vrot.lane.b32.xlu0 %v115_v29, %s925_s23 }
  0x88   :  { %v95_v30 = vpop.permute.xlu0 %94  ;;  %v97_v51 = vpop.permute.xlu1 %96 }
  0x89   :  { %v103_v32 = vmul.f32 %v95_v30, %v1008_v19  ;;  %v105_v52 = vmul.f32 %v97_v51, %v989_v16  ;;  %v99_v54 = vsel %vm98_vm3, %v95_v30, %v97_v51  ;;  %v259_v55 = vmul.f32 %v1001_v18, %v97_v51 }
  0x8a   :  { %v104_v56 = vmul.f32 %v99_v54, %v984_v15  ;;  %v257_v58 = vmul.f32 %v1013_v20, %v95_v30  ;;  %v258_v59 = vmul.f32 %v996_v17, %v99_v54 }
  0x8b   :  { %357 = vrot.lane.b32.xlu1 %v266_v31, %s923_s0  ;;  %173 = vrot.lane.b32.xlu0 %v103_v32, %s926_s24 }
  0x8c   :  { %v81_v35 = vpop.permute.xlu0 %80  ;;  %v83_v57 = vpop.permute.xlu1 %82 }
  0x8d   :  { %v89_v36 = vmul.f32 %v81_v35, %v1008_v19  ;;  %v85_v60 = vsel %vm84_vm4, %v81_v35, %v83_v57  ;;  %v91_v61 = vmul.f32 %v83_v57, %v989_v16  ;;  %v256_v0 = vmul.f32 %v1001_v18, %v83_v57  ;;  %v35_v16 = vld [vmem:[%s1272_s5] sm:$0x7] }
  0x8e   :  { %v90_v62 = vmul.f32 %v85_v60, %v984_v15  ;;  %v255_v1 = vmul.f32 %v996_v17, %v85_v60  ;;  %v254_v2 = vmul.f32 %v1013_v20, %v81_v35 }
  0x8f   :  { %216 = vrot.lane.b32.xlu1 %v129_v34, %s924_s22  ;;  %159 = vrot.lane.b32.xlu0 %v89_v36, %s927_s25 }
  0x90   :  { %v226_v7 = vpop.permute.xlu0 %225  ;;  %v228_v10 = vpop.permute.xlu1 %227 }
  0x93   :  { %338 = vrot.lane.b32.xlu1 %v265_v38, %s924_s22  ;;  %239 = vrot.lane.b32.xlu0 %v140_v39, %s923_s0 }
  0x94   :  { %v347_v13 = vpop.permute.xlu0 %346  ;;  %v349_v18 = vpop.permute.xlu1 %348 }
  0x97   :  { %334 = vrot.lane.b32.xlu1 %v263_v40, %s924_s22  ;;  %359 = vrot.lane.b32.xlu0 %v267_v41, %s923_s0 }
  0x98   :  { %v224_v21 = vpop.permute.xlu0 %223  ;;  %v345_v22 = vpop.permute.xlu1 %344 }
  0x9b   :  { %202 = vrot.lane.b32.xlu1 %v117_v44, %s925_s23  ;;  %214 = vrot.lane.b32.xlu0 %v128_v45, %s924_s22 }
  0x9c   :  { %v1118_v23 = vpop.permute.xlu0 %186  ;;  %v189_v24 = vpop.permute.xlu1 %188 }
  0x9d   :  { %v192_v3 = vsel %vm190_vm9, %v1118_v23, %v189_v24 }
  0x9f   :  { %325 = vrot.lane.b32.xlu1 %v262_v46, %s925_s23  ;;  %336 = vrot.lane.b32.xlu0 %v264_v47, %s924_s22  ;;  %v231_v46 = vsel %vm229_vm6, %v226_v7, %v228_v10 }
  0xa0   :  { %v1120_v25 = vpop.permute.xlu0 %310  ;;  %v1122_v26 = vpop.permute.xlu1 %312 }
  0xa3   :  { %321 = vrot.lane.b32.xlu1 %v260_v49, %s925_s23  ;;  %200 = vrot.lane.b32.xlu0 %v116_v50, %s925_s23  ;;  %v230_v49 = vsel %vm229_vm6, %v224_v21, %v226_v7 }
  0xa4   :  { %v1124_v27 = vpop.permute.xlu0 %184  ;;  %v1126_v28 = vpop.permute.xlu1 %308 }
  0xa7   :  { %177 = vrot.lane.b32.xlu1 %v105_v52, %s926_s24  ;;  %323 = vrot.lane.b32.xlu0 %v261_v53, %s925_s23  ;;  %v351_v52 = vsel %vm229_vm6, %v347_v13, %v349_v18 }
  0xa8   :  { %v1128_v29 = vpop.permute.xlu0 %147  ;;  %v1130_v30 = vpop.permute.xlu1 %149 }
  0xab   :  { %302 = vrot.lane.b32.xlu1 %v259_v55, %s926_s24  ;;  %175 = vrot.lane.b32.xlu0 %v104_v56, %s926_s24  ;;  %v350_v55 = vsel %vm229_vm6, %v345_v22, %v347_v13  ;;  %v314_v13 = vsel %vm190_vm9, %v1126_v28, %v1120_v25  ;;  %v153_v28 = vsel %vm151_vm12, %v1128_v29, %v1130_v30 }
  0xac   :  { %v1132_v31 = vpop.permute.xlu0 %274  ;;  %v1134_v32 = vpop.permute.xlu1 %276 }
  0xad   :  { %v279_v30 = vsel %vm151_vm12, %v1132_v31, %v1134_v32 }
  0xaf   :  { %298 = vrot.lane.b32.xlu1 %v257_v58, %s926_s24  ;;  %300 = vrot.lane.b32.xlu0 %v258_v59, %s926_s24 }
  0xb3   :  { %163 = vrot.lane.b32.xlu1 %v91_v61, %s927_s25  ;;  %161 = vrot.lane.b32.xlu0 %v90_v62, %s927_s25 }
  0xb7   :  { %289 = vrot.lane.b32.xlu1 %v256_v0, %s927_s25  ;;  %287 = vrot.lane.b32.xlu0 %v255_v1, %s927_s25 }
  0xbb   :  { %285 = vrot.lane.b32.xlu1 %v254_v2, %s927_s25  ;;  %145 = vrot.lane.b32.xlu0 %v1008_v19, %s922_s21 }
  0xbf   :  { %272 = vrot.lane.b32.xlu1 %v1013_v20, %s922_s21  ;;  %374 = vperm.xlu0 %865, %v30_v4  }
  0xc3   :  { %369 = vperm.xlu1 %866, %v29_v5   ;;  %577 = vperm.xlu0 %865, %v33_v6   ;;  %v191_v6 = vsel %vm190_vm9, %v1124_v27, %v1118_v23 }
  0xc7   :  { %379 = vperm.xlu1 %866, %v31_v8   ;;  %582 = vperm.xlu0 %865, %v34_v9   ;;  %v315_v9 = vsel %vm190_vm9, %v1120_v25, %v1122_v26 }
  0xcb   :  { %572 = vperm.xlu1 %866, %v32_v11  }
  0xcf   :  { %671 = vperm.xlu1 %866, %v35_v16  }
  0xf1   :  { %v238_v33 = vpop.permute.xlu0 %237 }
  0xf5   :  { %v242_v34 = vpop.permute.xlu1 %241  ;;  %v213_v35 = vpop.permute.xlu0 %212 }
  0xf9   :  { %v362_v36 = vpop.permute.xlu1 %361  ;;  %v199_v37 = vpop.permute.xlu0 %198 }
  0xfd   :  { %v358_v38 = vpop.permute.xlu1 %357  ;;  %v1136_v39 = vpop.permute.xlu0 %173 }
 0x101   :  { %v217_v40 = vpop.permute.xlu1 %216  ;;  %v1138_v41 = vpop.permute.xlu0 %159 }
 0x105   :  { %v339_v42 = vpop.permute.xlu1 %338  ;;  %v240_v43 = vpop.permute.xlu0 %239 }
 0x106   :  { %v245_v44 = vsel %vm243_vm5, %v240_v43, %v242_v34  ;;  %v244_v45 = vsel %vm243_vm5, %v238_v33, %v240_v43 }
 0x107   :  { %406 = vmatprep.subr.mxu0 %v245_v44  ;;  %v27_v44 = vld [vmem:[%s1273_s2 + $0x8] sm:$0xff] }
 0x108   :  { %407 = vmatpush1.msra.mxu0 %v244_v45 }
 0x109   :  { %v335_v47 = vpop.permute.xlu1 %334  ;;  %408 = vmatprep.subr.mxu0 %v231_v46  ;;  %v360_v48 = vpop.permute.xlu0 %359 }
 0x10a   :  { %409 = vmatpush1.msra.mxu0 %v230_v49  ;;  %v364_v50 = vsel %vm243_vm5, %v360_v48, %v362_v36  ;;  %v363_v51 = vsel %vm243_vm5, %v358_v38, %v360_v48 }
 0x10b   :  { %489 = vmatprep.subr.mxu1 %v364_v50 }
 0x10c   :  { %490 = vmatpush1.msra.mxu1 %v363_v51 }
 0x10d   :  { %v203_v53 = vpop.permute.xlu1 %202  ;;  %491 = vmatprep.subr.mxu1 %v351_v52  ;;  %v215_v54 = vpop.permute.xlu0 %214 }
 0x10e   :  { %492 = vmatpush1.msra.mxu1 %v350_v55  ;;  %v220_v56 = vsel %vm218_vm7, %v215_v54, %v217_v40  ;;  %v219_v57 = vsel %vm218_vm7, %v213_v35, %v215_v54  ;;  %v58_v40 = vmul.f32 %v973_v12, %v1008_v19  ;;  %v253_v19 = vmul.f32 %v996_v17, %v976_v14 }
 0x10f   :  { %410 = vmatprep.subr.mxu0 %v220_v56 }
 0x110   :  { %411 = vmatpush1.msra.mxu0 %v219_v57 }
 0x111   :  { %v326_v58 = vpop.permute.xlu1 %325  ;;  %v337_v59 = vpop.permute.xlu0 %336 }
 0x112   :  { %v341_v60 = vsel %vm218_vm7, %v337_v59, %v339_v42  ;;  %v340_v61 = vsel %vm218_vm7, %v335_v47, %v337_v59 }
 0x113   :  { %493 = vmatprep.subr.mxu1 %v341_v60 }
 0x114   :  { %494 = vmatpush1.msra.mxu1 %v340_v61 }
 0x115   :  { %v322_v62 = vpop.permute.xlu1 %321  ;;  %v201_v0 = vpop.permute.xlu0 %200 }
 0x116   :  { %v206_v1 = vsel %vm204_vm8, %v201_v0, %v203_v53  ;;  %v205_v2 = vsel %vm204_vm8, %v199_v37, %v201_v0  ;;  %v59_v37 = vmul.f32 %v976_v14, %v984_v15  ;;  %v26_v15 = vld [vmem:[%s1273_s2] sm:$0xff] }
 0x117   :  { %412 = vmatprep.subr.mxu0 %v206_v1 }
 0x118   :  { %413 = vmatpush1.msra.mxu0 %v205_v2 }
 0x119   :  { %v178_v4 = vpop.permute.xlu1 %177  ;;  %414 = vmatprep.subr.mxu0 %v192_v3  ;;  %v324_v5 = vpop.permute.xlu0 %323 }
 0x11a   :  { %415 = vmatpush1.msra.mxu0 %v191_v6  ;;  %v328_v7 = vsel %vm204_vm8, %v324_v5, %v326_v58  ;;  %v327_v8 = vsel %vm204_vm8, %v322_v62, %v324_v5 }
 0x11b   :  { %495 = vmatprep.subr.mxu1 %v328_v7 }
 0x11c   :  { %496 = vmatpush1.msra.mxu1 %v327_v8 }
 0x11d   :  { %v303_v10 = vpop.permute.xlu1 %302  ;;  %497 = vmatprep.subr.mxu1 %v315_v9  ;;  %v176_v11 = vpop.permute.xlu0 %175 }
 0x11e   :  { %498 = vmatpush1.msra.mxu1 %v314_v13  ;;  %v181_v16 = vsel %vm179_vm10, %v176_v11, %v178_v4  ;;  %v180_v18 = vsel %vm179_vm10, %v1136_v39, %v176_v11 }
 0x11f   :  { %416 = vmatprep.subr.mxu0 %v181_v16 }
 0x120   :  { %417 = vmatpush1.msra.mxu0 %v180_v18 }
 0x121   :  { %v299_v21 = vpop.permute.xlu1 %298  ;;  %v301_v22 = vpop.permute.xlu0 %300 }
 0x122   :  { %v305_v23 = vsel %vm179_vm10, %v301_v22, %v303_v10  ;;  %v304_v24 = vsel %vm179_vm10, %v299_v21, %v301_v22 }
 0x123   :  { %499 = vmatprep.subr.mxu1 %v305_v23 }
 0x124   :  { %500 = vmatpush1.msra.mxu1 %v304_v24 }
 0x125   :  { %v164_v26 = vpop.permute.xlu1 %163  ;;  %v162_v27 = vpop.permute.xlu0 %161 }
 0x126   :  { %v167_v33 = vsel %vm165_vm11, %v162_v27, %v164_v26  ;;  %v166_v25 = vsel %vm165_vm11, %v1138_v41, %v162_v27 }
 0x127   :  { %418 = vmatprep.subr.mxu0 %v167_v33 }
 0x128   :  { %419 = vmatpush1.msra.mxu0 %v166_v25 }
 0x129   :  { %v290_v34 = vpop.permute.xlu1 %289  ;;  %420 = vmatprep.subr.mxu0 %v153_v28  ;;  %v288_v35 = vpop.permute.xlu0 %287 }
 0x12a   :  { %v292_v36 = vsel %vm165_vm11, %v288_v35, %v290_v34 }
 0x12b   :  { %501 = vmatprep.subr.mxu1 %v292_v36 }
 0x12d   :  { %v286_v38 = vpop.permute.xlu1 %285  ;;  %v146_v39 = vpop.permute.xlu0 %145 }
 0x12e   :  { %v152_v41 = vsel %vm151_vm12, %v146_v39, %v1128_v29  ;;  %v291_v42 = vsel %vm165_vm11, %v286_v38, %v288_v35  ;;  %v252_v29 = vmul.f32 %v1013_v20, %v973_v12  ;;  %v28_v12 = vld [vmem:[%s1273_s2 + $0x10] sm:$0xff] }
 0x12f   :  { %421 = vmatpush1.msra.mxu0 %v152_v41  ;;  %502 = vmatpush1.msra.mxu1 %v291_v42 }
 0x130   :  { %422 = vmatprep.subr.mxu0 %v59_v37  ;;  %503 = vmatprep.subr.mxu1 %v279_v30 }
 0x131   :  { %v273_v43 = vpop.permute.xlu1 %272  ;;  %423 = vmatpush1.msra.mxu0 %v58_v40 }
 0x132   :  { %825 = vmatmul.mubr.msk.f32.vlgmr.msra.gmra.mxu0 %vm382_vm13, %v26_v15  ;;  %v278_v32 = vsel %vm151_vm12, %v273_v43, %v1132_v31 }
 0x133   :  { %504 = vmatpush1.msra.mxu1 %v278_v32  ;;  %462 = vmatprep.mubr.f32.mxu0 %v928_v63 }
 0x134   :  { %505 = vmatprep.subr.mxu1 %v253_v19 }
 0x135   :  { %506 = vmatpush1.msra.mxu1 %v252_v29 }
 0x136   :  { %826 = vmatmul.mubr.msk.f32.gmra.mxu0 %vm382_vm13, %v27_v44  ;;  %828 = vmatmul.mubr.msk.f32.vlgmr.msra.gmra.mxu1 %vm382_vm13, %v26_v15 }
 0x137   :  { %468 = vmatprep.mubr.f32.mxu0 %v928_v63  ;;  %545 = vmatprep.mubr.f32.mxu1 %v928_v63 }
 0x13a   :  { %827 = vmatmul.mubr.msk.f32.gmra.mxu0 %vm382_vm13, %v28_v12  ;;  %829 = vmatmul.mubr.msk.f32.gmra.mxu1 %vm382_vm13, %v27_v44  ;;  %v375_v45 = vpop.permute.xlu0 %374 }
 0x13b   :  { %551 = vmatprep.mubr.f32.mxu1 %v928_v63 }
 0x13e   :  { %830 = vmatmul.mubr.msk.f32.gmra.mxu1 %vm382_vm13, %v28_v12  ;;  %v370_v14 = vpop.permute.xlu1 %369  ;;  %v578_v61 = vpop.permute.xlu0 %577 }
 0x142   :  { %v1202_v17 = vpop.permute.xlu1 %379 }
 0x146   :  { %v573_v47 = vpop.permute.xlu1 %572 }
 0x1f2   :  { %v458_v20 = vpop.f32.mrf.mxu0 }
 0x1f3   :  { %v459_v31 = vadd.f32 %v458_v20, %v370_v14 }
 0x1f4   :  { %v460_v46 = vpop.f32.mrf.mxu0 }
 0x1f5   :  { %v558_v48 = vmax.f32 %v459_v31, 0.0  ;;  %v461_v49 = vadd.f32 %v460_v46, %v370_v14 }
 0x1f6   :  { %v464_v50 = vpop.f32.mrf.mxu0  ;;  %v541_v51 = vpop.f32.mrf.mxu1 }
 0x1f7   :  { %762 = vst [vmem:[%s1274_s7] sm:$0xff] %v558_v48  ;;  %v559_v52 = vmax.f32 %v461_v49, 0.0  ;;  %v585_v63 = vmul.f32 %v573_v47, %v558_v48  ;;  %v465_v53 = vadd.f32 %v464_v50, %v375_v45  ;;  %v542_v54 = vadd.f32 %v541_v51, %v370_v14  ;;  %v1232_v49 = vpop.permute.xlu1 %671 }
 0x1f8   :  { %v543_v55 = vpop.f32.mrf.mxu1  ;;  %v466_v56 = vpop.f32.mrf.mxu0 }
 0x1f9   :  { %763 = vst [vmem:[%s1274_s7 + $0x8] sm:$0xff] %v559_v52  ;;  %v586_v57 = vmul.f32 %v573_v47, %v559_v52  ;;  %v597_v58 = vrot.slane %v585_v63, 4  ;;  %v562_v59 = vmax.f32 %v465_v53, 0.0  ;;  %v560_v60 = vmax.f32 %v542_v54, 0.0 }
 0x1fa   :  { %v544_v62 = vadd.f32 %v543_v55, %v370_v14  ;;  %v467_v0 = vadd.f32 %v466_v56, %v375_v45  ;;  %v470_v1 = vpop.f32.mrf.mxu0  ;;  %v547_v2 = vpop.f32.mrf.mxu1 }
 0x1fb   :  { %v598_v3 = vadd.f32 %v597_v58, %v585_v63  ;;  %v603_v4 = vrot.slane %v586_v57, 4  ;;  %764 = vst [vmem:[%s1274_s7 + $0x10] sm:$0xff] %v562_v59  ;;  %v587_v5 = vmul.f32 %v573_v47, %v560_v60  ;;  %843 = vst [vmem:[%s1274_s7 + $0x30] sm:$0xff] %v560_v60  ;;  %v589_v6 = vmul.f32 %v578_v61, %v562_v59  ;;  %v583_v56 = vpop.permute.xlu0 %582 }
 0x1fc   :  { %v561_v7 = vmax.f32 %v544_v62, 0.0  ;;  %v563_v8 = vmax.f32 %v467_v0, 0.0  ;;  %v471_v9 = vadd.f32 %v470_v1, %v1202_v17  ;;  %v548_v10 = vadd.f32 %v547_v2, %v375_v45  ;;  %v549_v16 = vpop.f32.mrf.mxu1 }
 0x1fd   :  { %v604_v11 = vadd.f32 %v603_v4, %v586_v57  ;;  %v621_v13 = vrot.slane %v589_v6, 4  ;;  %v599_v24 = vrot.slane %v598_v3, 2  ;;  %v609_v26 = vrot.slane %v587_v5, 4  ;;  %v472_v57 = vpop.f32.mrf.mxu0 }
 0x1fe   :  { %v588_v18 = vmul.f32 %v573_v47, %v561_v7  ;;  %844 = vst [vmem:[%s1274_s7 + $0x38] sm:$0xff] %v561_v7  ;;  %v590_v21 = vmul.f32 %v578_v61, %v563_v8  ;;  %765 = vst [vmem:[%s1274_s7 + $0x18] sm:$0xff] %v563_v8  ;;  %v566_v22 = vmax.f32 %v471_v9, 0.0  ;;  %v564_v23 = vmax.f32 %v548_v10, 0.0  ;;  %v553_v52 = vpop.f32.mrf.mxu1 }
 0x1ff   :  { %v622_v27 = vadd.f32 %v621_v13, %v589_v6  ;;  %v550_v34 = vadd.f32 %v549_v16, %v375_v45  ;;  %v605_v35 = vrot.slane %v604_v11, 2  ;;  %v600_v41 = vadd.f32 %v599_v24, %v598_v3 }
 0x200   :  { %v615_v33 = vrot.slane %v588_v18, 4  ;;  %v627_v25 = vrot.slane %v590_v21, 4  ;;  %766 = vst [vmem:[%s1274_s7 + $0x20] sm:$0xff] %v566_v22  ;;  %v591_v28 = vmul.f32 %v578_v61, %v564_v23  ;;  %845 = vst [vmem:[%s1274_s7 + $0x40] sm:$0xff] %v564_v23  ;;  %v610_v42 = vadd.f32 %v609_v26, %v587_v5  ;;  %v555_v5 = vpop.f32.mrf.mxu1 }
 0x201   :  { %v623_v36 = vrot.slane %v622_v27, 2  ;;  %v565_v40 = vmax.f32 %v550_v34, 0.0  ;;  %v606_v32 = vadd.f32 %v605_v35, %v604_v11  ;;  %v601_v31 = vrot.slane %v600_v41, 1 }
 0x202   :  { %v616_v37 = vadd.f32 %v615_v33, %v588_v18  ;;  %v628_v38 = vadd.f32 %v627_v25, %v590_v21  ;;  %v633_v39 = vrot.slane %v591_v28, 4  ;;  %v611_v45 = vrot.slane %v610_v42, 2 }
 0x203   :  { %v624_v30 = vadd.f32 %v623_v36, %v622_v27  ;;  %v592_v29 = vmul.f32 %v578_v61, %v565_v40  ;;  %846 = vst [vmem:[%s1274_s7 + $0x48] sm:$0xff] %v565_v40  ;;  %v607_v51 = vrot.slane %v606_v32, 1  ;;  %v673_v58 = vrot.slane %v1232_v49, 1 }
 0x204   :  { %v617_v15 = vrot.slane %v616_v37, 2  ;;  %v629_v19 = vrot.slane %v628_v38, 2  ;;  %v634_v43 = vadd.f32 %v633_v39, %v591_v28  ;;  %v593_v59 = vmul.f32 %v583_v56, %v566_v22 }
 0x205   :  { %v625_v44 = vrot.slane %v624_v30, 1  ;;  %v639_v20 = vrot.slane %v592_v29, 4  ;;  %v612_v60 = vadd.f32 %v611_v45, %v610_v42  ;;  %v602_v62 = vadd.f32 %v601_v31, %v600_v41 }
 0x206   :  { %v630_v12 = vadd.f32 %v629_v19, %v628_v38  ;;  %v635_v14 = vrot.slane %v634_v43, 2  ;;  %v618_v46 = vadd.f32 %v617_v15, %v616_v37  ;;  %v645_v2 = vrot.slane %v593_v59, 4 }
 0x207   :  { %v640_v50 = vadd.f32 %v639_v20, %v592_v29  ;;  %v626_v63 = vadd.f32 %v625_v44, %v624_v30  ;;  %v473_v3 = vadd.f32 %v472_v57, %v1202_v17  ;;  %v554_v4 = vadd.f32 %v553_v52, %v1202_v17 }
 0x208   :  { %v631_v47 = vrot.slane %v630_v12, 1  ;;  %v636_v48 = vadd.f32 %v635_v14, %v634_v43  ;;  %v619_v61 = vrot.slane %v618_v46, 1  ;;  %v608_v7 = vadd.f32 %v607_v51, %v606_v32 }
 0x209   :  { %v641_v55 = vrot.slane %v640_v50, 2  ;;  %v1238_v8 = vrot.slane %v1232_v49, 2  ;;  %v682_v9 = vadd.f32 %v673_v58, %v626_v63  ;;  %v646_v11 = vadd.f32 %v645_v2, %v593_v59 }
 0x20a   :  { %v632_v53 = vadd.f32 %v631_v47, %v630_v12  ;;  %v637_v54 = vrot.slane %v636_v48, 1  ;;  %v567_v13 = vmax.f32 %v473_v3, 0.0  ;;  %v568_v16 = vmax.f32 %v554_v4, 0.0 }
 0x20b   :  { %v642_v0 = vadd.f32 %v641_v55, %v640_v50  ;;  %v613_v18 = vrot.slane %v612_v60, 1  ;;  %v620_v21 = vadd.f32 %v619_v61, %v618_v46  ;;  %v678_v22 = vadd.f32 %v1232_v49, %v602_v62 }
 0x20c   :  { %v683_v1 = vadd.f32 %v673_v58, %v632_v53  ;;  %v638_v6 = vadd.f32 %v637_v54, %v636_v48  ;;  %v556_v23 = vadd.f32 %v555_v5, %v1202_v17  ;;  %v647_v27 = vrot.slane %v646_v11, 2  ;;  %767 = vst [vmem:[%s1274_s7 + $0x28] sm:$0xff] %v567_v13  ;;  %847 = vst [vmem:[%s1274_s7 + $0x50] sm:$0xff] %v568_v16 }
 0x20d   :  { %v643_v10 = vrot.slane %v642_v0, 1  ;;  %v594_v33 = vmul.f32 %v583_v56, %v567_v13  ;;  %v679_v25 = vadd.f32 %v1232_v49, %v608_v7  ;;  %v595_v34 = vmul.f32 %v583_v56, %v568_v16 }
 0x20e   :  { %v836_v24 = vmul.f32 -1.442695, %v683_v1  ;;  %v684_v28 = vadd.f32 %v673_v58, %v638_v6  ;;  %v569_v35 = vmax.f32 %v556_v23, 0.0  ;;  %v835_v36 = vmul.f32 -1.442695, %v682_v9 }
 0x20f   :  { %v644_v26 = vadd.f32 %v643_v10, %v642_v0  ;;  %v648_v17 = vadd.f32 %v647_v27, %v646_v11  ;;  %v651_v38 = vrot.slane %v594_v33, 4  ;;  %v614_v39 = vadd.f32 %v613_v18, %v612_v60 }
 0x210   :  { %v681_v40 = vadd.f32 %v1232_v49, %v620_v21  ;;  %v657_v41 = vrot.slane %v595_v34, 4  ;;  %v596_v42 = vmul.f32 %v583_v56, %v569_v35  ;;  %848 = vst [vmem:[%s1274_s7 + $0x58] sm:$0xff] %v569_v35  ;;  %867 = vpow2.f32 %v836_v24 }
 0x211   :  { %v685_v37 = vadd.f32 %v673_v58, %v644_v26  ;;  %v649_v15 = vrot.slane %v648_v17, 1  ;;  %v652_v19 = vadd.f32 %v651_v38, %v594_v33  ;;  %v831_v43 = vmul.f32 -1.442695, %v678_v22 }
 0x212   :  { %v837_v29 = vmul.f32 -1.442695, %v684_v28  ;;  %v658_v32 = vadd.f32 %v657_v41, %v595_v34  ;;  %v663_v44 = vrot.slane %v596_v42, 4  ;;  %v832_v12 = vmul.f32 -1.442695, %v679_v25 }
 0x213   :  { %v838_v30 = vmul.f32 -1.442695, %v685_v37  ;;  %869 = vpow2.f32 %v835_v36  ;;  %v650_v14 = vadd.f32 %v649_v15, %v648_v17  ;;  %v653_v20 = vrot.slane %v652_v19, 2 }
 0x214   :  { %v680_v31 = vadd.f32 %v1232_v49, %v614_v39  ;;  %v659_v45 = vrot.slane %v658_v32, 2  ;;  %v664_v46 = vadd.f32 %v663_v44, %v596_v42  ;;  %v834_v47 = vmul.f32 -1.442695, %v681_v40 }
 0x215   :  { %871 = vpow2.f32 %v838_v30  ;;  %v686_v48 = vadd.f32 %v1238_v8, %v650_v14  ;;  %v654_v50 = vadd.f32 %v653_v20, %v652_v19 }
 0x216   :  { %873 = vpow2.f32 %v837_v29  ;;  %v660_v51 = vadd.f32 %v659_v45, %v658_v32  ;;  %v665_v52 = vrot.slane %v664_v46, 2  ;;  %v833_v54 = vmul.f32 -1.442695, %v680_v31 }
 0x217   :  { %875 = vpow2.f32 %v832_v12  ;;  %v839_v63 = vmul.f32 -1.442695, %v686_v48  ;;  %v655_v53 = vrot.slane %v654_v50, 1 }
 0x218   :  { %877 = vpow2.f32 %v831_v43  ;;  %v661_v55 = vrot.slane %v660_v51, 1  ;;  %v666_v56 = vadd.f32 %v665_v52, %v664_v46 }
 0x219   :  { %879 = vpow2.f32 %v834_v47  ;;  %v656_v57 = vadd.f32 %v655_v53, %v654_v50 }
 0x21a   :  { %v662_v49 = vadd.f32 %v661_v55, %v660_v51  ;;  %v667_v58 = vrot.slane %v666_v56, 1  ;;  %881 = vpow2.f32 %v839_v63 }
 0x21b   :  { %v687_v59 = vadd.f32 %v1238_v8, %v656_v57  ;;  %883 = vpow2.f32 %v833_v54 }
 0x21c   :  { %v688_v60 = vadd.f32 %v1238_v8, %v662_v49  ;;  %v668_v61 = vadd.f32 %v667_v58, %v666_v56 }
 0x21d   :  { %v840_v62 = vmul.f32 -1.442695, %v687_v59  ;;  %v868_v0 = vpop.eup %867 }
 0x21e   :  { %v841_v1 = vmul.f32 -1.442695, %v688_v60  ;;  %v689_v2 = vadd.f32 %v1238_v8, %v668_v61  ;;  %v731_v6 = vadd.f32 1.0, %v868_v0 }
 0x21f   :  { %885 = vpow2.f32 %v840_v62 }
 0x220   :  { %v870_v3 = vpop.eup %869  ;;  %887 = vpow2.f32 %v841_v1  ;;  %v842_v4 = vmul.f32 -1.442695, %v689_v2 }
 0x221   :  { %v730_v9 = vadd.f32 1.0, %v870_v3 }
 0x222   :  { %v872_v5 = vpop.eup %871  ;;  %889 = vpow2.f32 %v842_v4 }
 0x223   :  { %v874_v7 = vpop.eup %873  ;;  %v733_v11 = vadd.f32 1.0, %v872_v5  ;;  %891 = vrcp.f32 %v731_v6 }
 0x224   :  { %v876_v10 = vpop.eup %875  ;;  %v732_v18 = vadd.f32 1.0, %v874_v7  ;;  %893 = vrcp.f32 %v730_v9 }
 0x225   :  { %v878_v13 = vpop.eup %877  ;;  %v727_v21 = vadd.f32 1.0, %v876_v10  ;;  %895 = vrcp.f32 %v733_v11 }
 0x226   :  { %v880_v16 = vpop.eup %879  ;;  %v726_v23 = vadd.f32 1.0, %v878_v13  ;;  %897 = vrcp.f32 %v732_v18 }
 0x227   :  { %v882_v22 = vpop.eup %881  ;;  %v729_v24 = vadd.f32 1.0, %v880_v16  ;;  %899 = vrcp.f32 %v727_v21 }
 0x228   :  { %v884_v8 = vpop.eup %883  ;;  %v734_v26 = vadd.f32 1.0, %v882_v22  ;;  %901 = vrcp.f32 %v726_v23 }
 0x229   :  { %v728_v33 = vadd.f32 1.0, %v884_v8  ;;  %903 = vrcp.f32 %v729_v24 }
 0x22a   :  { %905 = vrcp.f32 %v734_v26 }
 0x22c   :  { %v886_v27 = vpop.eup %885 }
 0x22d   :  { %v888_v25 = vpop.eup %887  ;;  %v735_v28 = vadd.f32 1.0, %v886_v27 }
 0x22e   :  { %v736_v34 = vadd.f32 1.0, %v888_v25 }
 0x22f   :  { %v890_v35 = vpop.eup %889  ;;  %907 = vrcp.f32 %v735_v28 }
 0x230   :  { %909 = vrcp.f32 %v728_v33  ;;  %v737_v36 = vadd.f32 1.0, %v890_v35  ;;  %v892_v37 = vpop.eup %891 }
 0x231   :  { %911 = vrcp.f32 %v736_v34  ;;  %v894_v17 = vpop.eup %893 }
 0x232   :  { %913 = vrcp.f32 %v737_v36  ;;  %v896_v38 = vpop.eup %895  ;;  %v775_v39 = vcombine.low %v894_v17, %v892_v37 }
 0x233   :  { %v898_v40 = vpop.eup %897 }
 0x234   :  { %v900_v41 = vpop.eup %899  ;;  %v803_v42 = vcombine.low %v898_v40, %v896_v38  ;;  %v777_v15 = vrot.slane %v775_v39, 7 }
 0x235   :  { %v902_v30 = vpop.eup %901 }
 0x236   :  { %v904_v19 = vpop.eup %903  ;;  %v774_v29 = vcombine.low %v902_v30, %v900_v41  ;;  %v805_v44 = vrot.slane %v803_v42, 7 }
 0x237   :  { %v906_v43 = vpop.eup %905 }
 0x238   :  { %v779_v14 = vsel %vm778_vm14, %v777_v15, %v774_v29 }
 0x239   :  { %v781_v48 = vsel %vm780_vm15, %v777_v15, %v779_v14 }
 0x23c   :  { %v908_v32 = vpop.eup %907 }
 0x23d   :  { %v910_v12 = vpop.eup %909  ;;  %v776_v20 = vcombine.low %v906_v43, %v908_v32 }
 0x23e   :  { %v912_v31 = vpop.eup %911  ;;  %v802_v45 = vcombine.low %v910_v12, %v904_v19 }
 0x23f   :  { %v914_v46 = vpop.eup %913  ;;  %v782_v47 = vrot.slane %v776_v20, 6 }
 0x240   :  { %v806_v50 = vsel %vm778_vm14, %v805_v44, %v802_v45  ;;  %v804_v51 = vcombine.low %v912_v31, %v914_v46 }
 0x241   :  { %v784_v52 = vsel %vm783_vm0, %v782_v47, %v781_v48  ;;  %v807_v54 = vsel %vm780_vm15, %v805_v44, %v806_v50 }
 0x242   :  { %v786_v63 = vsel %vm785_vm1, %v782_v47, %v784_v52  ;;  %v808_v53 = vrot.slane %v804_v51, 6 }
 0x243   :  { %788 = vst [vmem:[%s1275_s6] sm:$0x77] %v786_v63 }
 0x244   :  { %v809_v55 = vsel %vm783_vm0, %v808_v53, %v807_v54 }
 0x245   :  { %v810_v56 = vsel %vm785_vm1, %v808_v53, %v809_v55 }
 0x246   :  { %849 = vst [vmem:[%s1275_s6 + $0x8] sm:$0x77] %v810_v56 }

</bundles_post_ra>
